<compile_context>
chip_gen: v7x
topology: tpu7x:2x2x1
jax: 0.10.0
libtpu: 0.0.40
codegen_flags: <defaults>
</compile_context>

<pallas_src>
import jax
import jax.numpy as jnp
from jax.experimental import pallas as pl
from jax.experimental.pallas import tpu as pltpu


# ----------------------------------------------------------------------------
# Pallas kernel: (Cout, Cin) @ (Cin, ts) -> f32, + bias, fused epilogue
# ----------------------------------------------------------------------------

def _conv1x1_kernel(x_ref, w_ref, b_ref, o_ref):
    # x_ref: (1, Cin, ts)  w_ref: (Cout, Cin)  b_ref: (Cout, 1)  o_ref: (1, Cout, ts)
    y = jax.lax.dot_general(
        w_ref[...], x_ref[0],
        dimension_numbers=(((1,), (0,)), ((), ())),
        preferred_element_type=jnp.float32,
        precision=jax.lax.Precision.HIGHEST,
    )
    o_ref[0] = y + b_ref[...]


# ----------------------------------------------------------------------------
# Tiling helpers
# ----------------------------------------------------------------------------

def _round_up(x, m):
    return ((x + m - 1) // m) * m


def _pick_spatial_tile(S, Cin, Cout, vmem_budget_bytes=24 << 20):
    """Largest lane-dense spatial tile (multiple of 128, <= 2048) whose
    double-buffered f32 footprint (sublane-padded) fits the budget, preferring
    a tile that divides S so there is no ragged tail block."""
    if S <= 128:
        return S                                   # full-extent lane block is legal
    cin_p = _round_up(Cin, 8)
    cout_p = _round_up(Cout, 8)
    per_col = 2 * cin_p * 4 + 2 * cout_p * 4       # double-buffered in + out, f32
    ts = (vmem_budget_bytes // max(per_col, 1)) // 128 * 128
    ts = max(128, min(2048, ts))
    ts = min(ts, _round_up(S, 128))
    for cand in range(ts, 127, -128):              # prefer an exact divisor of S
        if S % cand == 0:
            return cand
    return ts                                      # ragged tail handled by pl.cdiv


# ----------------------------------------------------------------------------
# Wrapper: OutConv forward (NCHW in / NCHW out, PyTorch conventions)
# ----------------------------------------------------------------------------

def out_conv_forward(x_nchw, weight_oihw, bias):
    """y = Conv2d(x, weight, bias, kernel_size=1)  (PyTorch semantics)."""
    B, Cin, H, W = x_nchw.shape
    Cout, Cin2, kh, kw = weight_oihw.shape
    assert Cin == Cin2 and kh == 1 and kw == 1

    S = H * W
    x3d = x_nchw.reshape(B, Cin, S).astype(jnp.float32)       # free, contiguous
    wmat = weight_oihw.reshape(Cout, Cin).astype(jnp.float32)
    b2d = bias.reshape(Cout, 1).astype(jnp.float32)

    ts = _pick_spatial_tile(S, Cin, Cout)
    grid = (B, pl.cdiv(S, ts))

    y = pl.pallas_call(
        _conv1x1_kernel,
        out_shape=jax.ShapeDtypeStruct((B, Cout, S), jnp.float32),
        grid=grid,
        in_specs=[
            pl.BlockSpec((1, Cin, ts), lambda b, s: (b, 0, s)),   # activation tile
            pl.BlockSpec((Cout, Cin), lambda b, s: (0, 0)),       # resident weight
            pl.BlockSpec((Cout, 1), lambda b, s: (0, 0)),         # resident bias
        ],
        out_specs=pl.BlockSpec((1, Cout, ts), lambda b, s: (b, 0, s)),
        compiler_params=pltpu.CompilerParams(
            dimension_semantics=("parallel", "parallel"),
            vmem_limit_bytes=64 * 1024 * 1024,
        ),
    )(x3d, wmat, b2d)

    return y.reshape(B, Cout, H, W)


# ----------------------------------------------------------------------------
# Main
# ----------------------------------------------------------------------------

if __name__ == "__main__":
    in_channels, out_channels = 32, 4
    B, H, W = 2, 16, 16

    key = jax.random.PRNGKey(0)
    kx, kw, kb = jax.random.split(key, 3)
    x = jax.random.normal(kx, (B, in_channels, H, W), jnp.float32)
    weight = jax.random.normal(kw, (out_channels, in_channels, 1, 1), jnp.float32) * 0.1
    bias = jax.random.normal(kb, (out_channels,), jnp.float32) * 0.1

    out = jax.jit(out_conv_forward)(x, weight, bias)
    out = jax.block_until_ready(out)

    assert out.shape == (B, out_channels, H, W), out.shape
    assert bool(jnp.all(jnp.isfinite(out)))

    # Pure-JAX f32 reference (PyTorch Conv2d semantics).
    wm = weight.reshape(out_channels, in_channels)
    ref = jnp.einsum("oc,bchw->bohw", wm, x,
                     precision=jax.lax.Precision.HIGHEST) + bias[None, :, None, None]
    assert bool(jnp.allclose(out, ref, atol=1e-2, rtol=1e-2))

    print("KERNEL_OK")
</pallas_src>

<mosaic_0001>
module attributes {stable_mosaic.version = 11 : i64} {
  func.func @_conv1x1_kernel(%arg0: i32, %arg1: i32, %arg2: memref<1x32x256xf32, #tpu.memory_space<vmem>>, %arg3: memref<4x32xf32, #tpu.memory_space<vmem>>, %arg4: memref<4x1xf32, #tpu.memory_space<vmem>>, %arg5: memref<1x4x256xf32, #tpu.memory_space<vmem>>) attributes {dimension_semantics = [#tpu.dimension_semantics<parallel>, #tpu.dimension_semantics<parallel>], iteration_bounds = array<i64: 2, 1>, scalar_prefetch = 0 : i64, scratch_operands = 0 : i64, tpu.core_type = #tpu.core_type<tc>, window_params = [{transform_indices = @transform_0, window_bounds = array<i64: 1, 32, 256>}, {pipeline_mode = #tpu.pipeline_mode<synchronous>, transform_indices = @transform_1, window_bounds = array<i64: 4, 32>}, {pipeline_mode = #tpu.pipeline_mode<synchronous>, transform_indices = @transform_2, window_bounds = array<i64: 4, 1>}, {transform_indices = @transform_3, window_bounds = array<i64: 1, 4, 256>}]} {
    %c0 = arith.constant 0 : index
    %c0_0 = arith.constant 0 : index
    %0 = vector.load %arg3[%c0, %c0_0] : memref<4x32xf32, #tpu.memory_space<vmem>>, vector<4x32xf32>
    %c0_1 = arith.constant 0 : index
    %c0_2 = arith.constant 0 : index
    %c0_3 = arith.constant 0 : index
    %1 = vector.load %arg2[%c0_1, %c0_2, %c0_3] : memref<1x32x256xf32, #tpu.memory_space<vmem>>, vector<1x32x256xf32>
    %2 = vector.shape_cast %1 : vector<1x32x256xf32> to vector<32x256xf32>
    %cst = arith.constant dense<0.000000e+00> : vector<4x256xf32>
    %3 = tpu.matmul %0, %2, %cst {dimension_numbers = #tpu.dot_dimension_numbers<[1], [0], [0], [1], [0, 0, 1, 1], [], []>, precision = #tpu.contract_precision<fp32>} : vector<4x32xf32>, vector<32x256xf32>, vector<4x256xf32> -> vector<4x256xf32>
    %c0_4 = arith.constant 0 : index
    %c0_5 = arith.constant 0 : index
    %4 = vector.load %arg4[%c0_4, %c0_5] : memref<4x1xf32, #tpu.memory_space<vmem>>, vector<4x1xf32>
    %5 = vector.broadcast %4 : vector<4x1xf32> to vector<4x256xf32>
    %6 = arith.addf %3, %5 : vector<4x256xf32>
    %c0_6 = arith.constant 0 : index
    %c0_7 = arith.constant 0 : index
    %c0_8 = arith.constant 0 : index
    %7 = vector.load %arg5[%c0_6, %c0_7, %c0_8] : memref<1x4x256xf32, #tpu.memory_space<vmem>>, vector<1x4x256xf32>
    %8 = vector.shape_cast %7 : vector<1x4x256xf32> to vector<4x256xf32>
    %9 = vector.shape_cast %6 : vector<4x256xf32> to vector<1x4x256xf32>
    tpu.vector_store %arg5[%c0_6, %c0_7, %c0_8], %9 {strides = array<i32>} : memref<1x4x256xf32, #tpu.memory_space<vmem>>, vector<1x4x256xf32>,
    return
  }
  func.func @transform_0(%arg0: i32, %arg1: i32) -> (i32, i32, i32) {
    %c0_i32 = arith.constant 0 : i32
    %c0_i32_0 = arith.constant 0 : i32
    return %arg0, %c0_i32, %arg1 : i32, i32, i32
  }
  func.func @transform_1(%arg0: i32, %arg1: i32) -> (i32, i32) {
    %c0_i32 = arith.constant 0 : i32
    %c0_i32_0 = arith.constant 0 : i32
    %c0_i32_1 = arith.constant 0 : i32
    return %c0_i32, %c0_i32_0 : i32, i32
  }
  func.func @transform_2(%arg0: i32, %arg1: i32) -> (i32, i32) {
    %c0_i32 = arith.constant 0 : i32
    %c0_i32_0 = arith.constant 0 : i32
    %c0_i32_1 = arith.constant 0 : i32
    return %c0_i32, %c0_i32_0 : i32, i32
  }
  func.func @transform_3(%arg0: i32, %arg1: i32) -> (i32, i32, i32) {
    %c0_i32 = arith.constant 0 : i32
    %c0_i32_0 = arith.constant 0 : i32
    return %arg0, %c0_i32, %arg1 : i32, i32, i32
  }
}

</mosaic_0001>

<bundles_post_ra>
// kernel: out_conv_forward.1
= control target key start
LH: loop header
LB: loop body
LE: loop exit
PB: predicated region body
PF: predicated region fallthrough
CT: control target
= control target key end

     0   :  { %8 = vsyncpa [#allocation3], 0  ;;  %s1612_s0 = inlined_call_operand.hbm [shape: f32[2,32,256], index: 0, kind: input, shape index: {}]   ;;  %s1613_s1 = inlined_call_operand.hbm [shape: f32[4,32], index: 1, kind: input, shape index: {}]   ;;  %s1614_s2 = inlined_call_operand.hbm [shape: f32[4,1], index: 2, kind: input, shape index: {}]   ;;  %s1615_s3 = inlined_call_operand.hbm [shape: f32[2,4,256], index: 3, kind: output, shape index: {}]  }
   0x1   :  { %10 = vsyncpa [#allocation3 + $0x1], 0 }
   0x2   :  { %11 = vsyncpa [#allocation6], 0 }
   0x3   :  { %12 = vsyncpa [#allocation4], 0 }
   0x4   :  { %14 = vsyncpa [#allocation4 + $0x1], 0  ;;  %s1292_s12 = smov 0   ;;  %s1294_s13 = smov 0  }
   0x5   :  { %s1296_s14 = smov 0   ;;  %s1298_s15 = smov 0  }
   0x6   :  { %s1300_s16 = smov 0   ;;  %s1302_s17 = smov 0  }
   0x7 LB: > { %s921_s18 = sadd.s32 4294967295, %s1262_s17   ;;  %s922_s19 = sadd.s32 4294967294, %s1262_s17   ;;  %s1262_s17 = sphi %s1302_s17, %s20_s17   ;;  %s1258_s16 = sphi %s1300_s16, %s1641_s16   ;;  %s1254_s15 = sphi %s1298_s15, %s1640_s15   ;;  %s1250_s14 = sphi %s1296_s14, %s1639_s14   ;;  %s1246_s13 = sphi %s1294_s13, %s1638_s13   ;;  %s1242_s12 = sphi %s1292_s12, %s1637_s12  }
   0x8   : > { %s41_s20 = sadd.s32 1, %s1250_s14  ;;  %p48_p0 = scmp.ne.s32.totalorder %s1250_s14, %s1246_s13 }
   0x9   : > { %p49_p1 = scmp.eq.s32.totalorder %s1262_s17, 0  ;;  %p54_p2 = scmp.ne.s32.totalorder %s1246_s13, %s1242_s12 }
   0xa   : > { %p1330_p3 = scmp.eq.s32.totalorder %s921_s18, 0  ;;  %p122_p4 = scmp.eq.s32.totalorder %s921_s18, 1 }
   0xb   : > { %p1334_p5 = por %p49_p1, %p48_p0  ;;  %p128_p6 = scmp.eq.s32.totalorder %s922_s19, 1 }
   0xc   : > { %s1622_s21 = scalar_select %p1330_p3, 1, 0 }
   0xd   : > { %p1340_p7 = por %p1330_p3, %p54_p2  ;;  %p1344_p8 = por %p122_p4, %p48_p0 }
   0xe   : > { %p1348_p9 = por %p128_p6, %p54_p2  ;;  %p923_p10 = scmp.ge.s32.totalorder %s1262_s17, 1 }
   0xf   : > { %s1624_s23 = scalar_select %p1340_p7, 1, 0 }
  0x10   : > { %s1625_s24 = scalar_select %p1344_p8, 1, 0 }
  0x11   : > { %s1626_s25 = scalar_select %p1348_p9, 1, 0 }
  0x12   : > { %p135_p11 = scmp.lt.s32.totalorder %s1262_s17, 3  ;;  %s1264_s27 = smov [#allocation5]  }
  0x13   : > { %s148_s28 = sshll.u32 %s1264_s27, 4  ;;  %p1031_p1 = scmp.lt.s32.totalorder %s1262_s17, 2  ;;  %s149_s28 = int_to_ptr.vmem [resolvable:$true] %s148_s28 }
  0x14   : > { %p1355_p13 = pnand %p923_p10, %p135_p11  ;;  %s1265_s30 = smov [#allocation7]  }
  0x15   : > { %p1364_p4 = pnand %p1031_p1, %p1334_p5  ;;  %s159_s4 = sshll.u32 %s1265_s30, 4  ;;  %s1374_s4 = int_to_ptr.vmem [resolvable:$true] %s159_s4 }
  0x16   : > { %s1627_s26 = scalar_select %p1355_p13, 1, 0 }
  0x17   : > { %p1014_p0 = pneg %p1355_p13  ;;  %s1090_s8 = scalar_lea.hbm %s1613_s1, 64 }
  0x18   : > { %s1628_s29 = scalar_select %p1364_p4, 1, 0 }
  0x19   : > { %p1370_p2 = pnand %p1014_p0, %p1330_p3  ;;  %p1091_p5 = scmp.ne.s32.totalorder %s1613_s1, %s1090_s8 }
  0x1a   : > { %p1097_p1 = scmp.lt.u32.totalorder %s1090_s8, %s1613_s1 }
  0x1b   : > { %p1092_p6 = pneg %p1370_p2 }
  0x1d   : > { %p1093_p10 = pnand %p1092_p6, %p1091_p5 }
  0x1f   : > { %p1094_p11 = pneg %p1093_p10 }
  0x21   : > { %p1099_p0 = pnand %p1097_p1, %p1094_p11 }
  0x23   : > { %1102 = shalt.err (!%p1099_p0)
}
  0x24   : > { %s1103_s19 = scalar_lea.vmem %s149_s28, 64  ;;  %p1111_p3 = scmp.lt.s32.totalorder %s149_s28, %s149_s28 }
  0x25   : > { %p1104_p12 = scmp.ne.s32.totalorder %s149_s28, %s1103_s19  ;;  %p1112_p7 = scmp.lt.s32.totalorder %s1103_s19, %s1103_s19 }
  0x27   : > { %p1106_p9 = pnand %p1104_p12, %p1092_p6  ;;  %p1113_p13 = por %p1112_p7, %p1111_p3 }
  0x29   : > { %p1107_p8 = pneg %p1106_p9 }
  0x2b   : > { %p1114_p4 = pnand %p1113_p13, %p1107_p8 }
  0x2d   : > { %1117 = shalt.err (!%p1114_p4)
}
  0x2e   : > { %1017 = dma.hbm_to_vmem [thread:$0]  (!%p1370_p2), %s1613_s1, 64, %s149_s28, [#allocation6]  }
  0x2f   : > { %s1118_s7 = scalar_lea.hbm %s1614_s2, 64 }
  0x30   : > { %p1119_p9 = scmp.ne.s32.totalorder %s1614_s2, %s1118_s7  ;;  %p1125_p8 = scmp.lt.u32.totalorder %s1118_s7, %s1614_s2 }
  0x32   : > { %p1121_p3 = pnand %p1119_p9, %p1092_p6 }
  0x34   : > { %p1122_p7 = pneg %p1121_p3 }
  0x36   : > { %p1127_p12 = pnand %p1125_p8, %p1122_p7 }
  0x38   : > { %1130 = shalt.err (!%p1127_p12)
}
  0x39   : > { %s1131_s28 = scalar_lea.vmem %s1374_s4, 64  ;;  %p1139_p10 = scmp.lt.s32.totalorder %s1374_s4, %s1374_s4 }
  0x3a   : > { %p1132_p13 = scmp.ne.s32.totalorder %s1374_s4, %s1131_s28  ;;  %p1140_p11 = scmp.lt.s32.totalorder %s1131_s28, %s1131_s28 }
  0x3c   : > { %p1134_p4 = pnand %p1132_p13, %p1092_p6  ;;  %p1141_p1 = por %p1140_p11, %p1139_p10 }
  0x3e   : > { %p1135_p5 = pneg %p1134_p4 }
  0x40   : > { %p1142_p0 = pnand %p1141_p1, %p1135_p5 }
  0x42   : > { %1145 = shalt.err (!%p1142_p0)
}
  0x43   : > { %1020 = dma.hbm_to_vmem [thread:$0]  (!%p1370_p2), %s1614_s2, 64, %s1374_s4, [#allocation6]  }
  0x44   : > { %s32_s22 = sadd.s32 1, %s1258_s16  ;;  %s170_s27 = sand.u32 1, %s1250_s14  }
  0x45   : > { %p34_p6 = scmp.ge.s32.totalorder %s32_s22, 2  ;;  %s927_s30 = sshll.u32 %s170_s27, 6 }
  0x46   : > { %s940_s6 = sshll.u32 %s1258_s16, 10  ;;  %s174_s4 = scalar_lea.vmem [#allocation2], %s927_s30 }
  0x47   : > { %s1643_s22 = smov (%p34_p6, %s32_s22), 0  ;;  %s1431_s8 = scalar_lea.hbm %s1612_s0, %s940_s6 }
  0x48   : > { %s36_s9 = ssub.s32 %s1258_s16, %s1643_s22  ;;  %s183_s10 = sshll.u32 %s174_s4, 4  ;;  %s1435_s10 = int_to_ptr.vmem [resolvable:$true] %s183_s10 }
  0x49   : > { %p39_p2 = scmp.eq.s32.totalorder %s36_s9, 0  ;;  %s1442_s28 = scalar_lea.sflag [#allocation3], %s170_s27 }
  0x4a   : > { %s1146_s18 = scalar_lea.hbm %s1431_s8, 1024  ;;  %p1630_p3 = scmp.ne.s32.totalorder %s1628_s29, 0 }
  0x4b   : > { %s1440_s11 = scalar_select %p39_p2, %s1250_s14, %s41_s20  }
  0x4c   : > { %p1147_p9 = scmp.ne.s32.totalorder %s1431_s8, %s1146_s18  ;;  %p1148_p7 = pneg %p1630_p3 }
  0x4d   : > { %s1151_s30 = scalar_lea.hbm %s1612_s0, 2048  ;;  %p1152_p13 = scmp.lt.u32.totalorder %s1431_s8, %s1612_s0 }
  0x4e   : > { %p1149_p8 = pnand %p1148_p7, %p1147_p9  ;;  %p1153_p4 = scmp.lt.u32.totalorder %s1151_s30, %s1146_s18 }
  0x4f   : > { %p1155_p10 = scmp.lt.u32.totalorder %s1146_s18, %s1431_s8 }
  0x50   : > { %p1150_p12 = pneg %p1149_p8  ;;  %p1154_p5 = por %p1153_p4, %p1152_p13 }
  0x52   : > { %p1156_p11 = por %p1155_p10, %p1154_p5 }
  0x54   : > { %p1157_p1 = pnand %p1156_p11, %p1150_p12 }
  0x56   : > { %1160 = shalt.err (!%p1157_p1)
}
  0x57   : > { %s1161_s20 = scalar_lea.vmem %s1435_s10, 1024  ;;  %s1266_s27 = smov [#allocation2]  }
  0x58   : > { %p1162_p0 = scmp.ne.s32.totalorder %s1435_s10, %s1161_s20  ;;  %s1166_s9 = sshll.u32 %s1266_s27, 4  ;;  %s1167_s9 = int_to_ptr.vmem [resolvable:$false] %s1166_s9 }
  0x59   : > { %s1168_s4 = scalar_lea.vmem %s1167_s9, 2048  ;;  %p1169_p9 = scmp.lt.s32.totalorder %s1435_s10, %s1167_s9 }
  0x5a   : > { %p1164_p6 = pnand %p1162_p0, %p1148_p7  ;;  %p1170_p8 = scmp.lt.s32.totalorder %s1168_s4, %s1161_s20 }
  0x5c   : > { %p1165_p2 = pneg %p1164_p6  ;;  %p1171_p13 = por %p1170_p8, %p1169_p9 }
  0x5e   : > { %p1172_p4 = pnand %p1171_p13, %p1165_p2 }
  0x60   : > { %1175 = shalt.err (!%p1172_p4)
}
  0x61   : > { %s1267_s18 = smov 256   ;;  %s1268_s19 = smov 16  }
  0x62   : > { %1024 = dma.hbm_to_vmem [thread:$0]  (!%p1630_p3), %s1431_s8, 1024, %s1435_s10, %s1442_s28, %s1267_s18, %s1267_s18, %s1268_s19  }
  0x63   : > { %p1631_p7 = scmp.ne.s32.totalorder %s1627_s26, 0 }
  0x64   : > { %s1473_s6 = sand.u32 (!%p1631_p7), 1, %s1246_s13   ;;  %p1632_p12 = scmp.ne.s32.totalorder (!%p1631_p7), %s1624_s23, 0 }
  0x65   : > { %195 = sbr.rel (%p1631_p7) target bundleno = 378 (0x17a), region = 32  ;;  %s931_s30 = sshll.u32 (!%p1631_p7), %s1473_s6, 6 }
  0x66   : > { %s198_s5 = scalar_lea.sflag (!%p1631_p7), [#allocation3], %s1473_s6  ;;  %s201_s7 = scalar_lea.vmem (!%p1631_p7), [#allocation2], %s931_s30 }
  0x6c   : > { %1229 = dma.done.wait (%p1632_p12), %s198_s5, 1024  }
  0x6d   : > { %1231 = vsyncadd (%p1632_p12), %s198_s5, 4294966272  ;;  %p1633_p5 = scmp.ne.s32.totalorder %s1622_s21, 0 }
  0x6f   : > { %1233 = dma.done.wait (%p1633_p5), [#allocation6], 128  }
  0x70   : > { %1235 = vsyncadd (%p1633_p5), [#allocation6], 4294967168  ;;  %v1269_v0 = vmov 0.0   ;;  %v1270_v1 = vmov 0   ;;  %v236_v2 = vld [vmem:[%s201_s7 + $0x8] sm:$0xff]  ;;  %v238_v3 = vld [vmem:[%s201_s7 + $0x18] sm:$0xff] }
  0x71   : > { %325 = vmatprep.mubr.f32.mxu1 %v1269_v0  ;;  %610 = vmatprep.mubr.f32.mxu0 %v1269_v0  ;;  %v235_v4 = vld [vmem:[%s201_s7] sm:$0xff]  ;;  %v253_v5 = vand.u32 4294901760, %v236_v2  ;;  %v257_v6 = vand.u32 4294901760, %v238_v3  ;;  %v237_v7 = vld [vmem:[%s201_s7 + $0x10] sm:$0xff]  ;;  %v240_v9 = vld [vmem:[%s201_s7 + $0x28] sm:$0xff]  ;;  %vm249_vm0 = vcmask 261120  }
  0x72   : > { %1089 = vset.pattern.permute.xlu0 %v1270_v1  ;;  %v255_v8 = vand.u32 4294901760, %v235_v4  ;;  %v242_v10 = vld [vmem:[%s201_s7 + $0x38] sm:$0xff]  ;;  %v259_v11 = vand.u32 4294901760, %v237_v7  ;;  %v261_v12 = vand.u32 4294901760, %v240_v9  ;;  %v239_v14 = vld [vmem:[%s201_s7 + $0x20] sm:$0xff]  ;;  %v241_v15 = vld [vmem:[%s201_s7 + $0x30] sm:$0xff] }
  0x73   : > { %v265_v13 = vand.u32 4294901760, %v242_v10  ;;  %v1487_v16 = vpack.c.bf16 %v257_v6, %v253_v5  ;;  %v1489_v17 = vsub.f32 %v236_v2, %v253_v5  ;;  %v1491_v18 = vsub.f32 %v238_v3, %v257_v6  ;;  %v234_v20 = vld [vmem:[#allocation5] sm:$0xf]  ;;  %v243_v21 = vld [vmem:[#allocation7] sm:$0xf]  ;;  %s934_s21 = sshll.u32 %s1473_s6, 3 }
  0x74   : > { %v1493_v19 = vsub.f32 %v235_v4, %v255_v8  ;;  %v1495_v22 = vpack.c.bf16 %v259_v11, %v255_v8  ;;  %v1497_v23 = vsub.f32 %v237_v7, %v259_v11  ;;  %v1501_v25 = vsub.f32 %v240_v9, %v261_v12  ;;  %246 = vperm.xlu0 %1089, %v243_v21   ;;  %s941_s23 = sshll.u32 %s1254_s15, 7  ;;  %s231_s26 = scalar_lea.vmem [#allocation8], %s934_s21 }
  0x75   : > { %v1499_v24 = vpack.c.bf16 %v265_v13, %v261_v12  ;;  %943 = vmatprep.subr.bf16.mxu1 %v1487_v16  ;;  %967 = vmatprep.subr.bf16.mxu0 %v1487_v16  ;;  %v1505_v26 = vsub.f32 %v242_v10, %v265_v13  ;;  %v263_v27 = vand.u32 4294901760, %v239_v14  ;;  %v267_v28 = vand.u32 4294901760, %v241_v15  ;;  %s818_s29 = sshll.u32 %s231_s26, 4  ;;  %s1563_s28 = scalar_lea.hbm %s1615_s3, %s941_s23  ;;  %s1565_s29 = int_to_ptr.vmem [resolvable:$true] %s818_s29 }
  0x76   : > { %v251_v29 = vsel %vm249_vm0, %v234_v20, 0  ;;  %945 = vmatpush1.bf16.msra.mxu1 %v1495_v22  ;;  %969 = vmatpush1.bf16.msra.mxu0 %v1495_v22  ;;  %v339_v31 = vand.u32 4294901760, %v1489_v17  ;;  %v351_v32 = vand.u32 4294901760, %v1491_v18  ;;  %v345_v33 = vand.u32 4294901760, %v1493_v19  ;;  %s802_s20 = scalar_lea.sflag [#allocation4], %s1473_s6  ;;  %s1176_s27 = scalar_lea.vmem %s1565_s29, 128 }
  0x77   : > { %v1510_v30 = vand.u32 4294901760, %v251_v29  ;;  %947 = vmatprep.subr.bf16.mxu1 %v1499_v24  ;;  %971 = vmatprep.subr.bf16.mxu0 %v1499_v24  ;;  %v1517_v34 = vpack.c.bf16 %v267_v28, %v263_v27  ;;  %v1519_v35 = vsub.f32 %v239_v14, %v263_v27  ;;  %v1521_v36 = vsub.f32 %v241_v15, %v267_v28  ;;  %p1177_p3 = scmp.ne.s32.totalorder %s1565_s29, %s1176_s27  ;;  %p1634_p10 = scmp.ne.s32.totalorder %s1625_s24, 0 }
  0x78   : > { %v357_v37 = vand.u32 4294901760, %v1497_v23  ;;  %v340_v39 = vsub.f32 %v1489_v17, %v339_v31  ;;  %v352_v40 = vsub.f32 %v1491_v18, %v351_v32  ;;  %v974_v41 = vpack.c.bf16 %v351_v32, %v339_v31  ;;  %s1271_s15 = smov [#allocation8]  }
  0x79   : > { %v327_v38 = vsub.f32 %v251_v29, %v1510_v30  ;;  %v346_v42 = vsub.f32 %v1493_v19, %v345_v33  ;;  %v363_v45 = vand.u32 4294901760, %v1501_v25  ;;  %v375_v49 = vand.u32 4294901760, %v1505_v26  ;;  %p1178_p11 = pnand %p1177_p3, %p1634_p10  ;;  %s1180_s9 = sshll.u32 %s1271_s15, 4  ;;  %s1181_s9 = int_to_ptr.vmem [resolvable:$false] %s1180_s9 }
  0x7a   : > { %v358_v43 = vsub.f32 %v1497_v23, %v357_v37  ;;  %v976_v44 = vpack.c.bf16 %v357_v37, %v345_v33  ;;  %949 = vmatpush1.bf16.msra.mxu1 %v1517_v34  ;;  %973 = vmatpush1.bf16.msra.mxu0 %v1517_v34  ;;  %v341_v47 = vand.u32 4294901760, %v340_v39  ;;  %v353_v48 = vand.u32 4294901760, %v352_v40  ;;  %s1182_s4 = scalar_lea.vmem %s1181_s9, 256  ;;  %p1183_p0 = scmp.lt.s32.totalorder %s1565_s29, %s1181_s9 }
  0x7b   : > { %v328_v46 = vand.u32 4294901760, %v327_v38  ;;  %975 = vmatprep.subr.bf16.mxu0 %v974_v41  ;;  %v347_v50 = vand.u32 4294901760, %v346_v42  ;;  %v364_v52 = vsub.f32 %v1501_v25, %v363_v45  ;;  %v369_v53 = vand.u32 4294901760, %v1519_v35  ;;  %p1179_p1 = pneg %p1178_p11  ;;  %p1184_p6 = scmp.lt.s32.totalorder %s1182_s4, %s1176_s27 }
  0x7c   : > { %v359_v51 = vand.u32 4294901760, %v358_v43  ;;  %v950_v55 = vpack.c.bf16 %v353_v48, %v341_v47  ;;  %v376_v56 = vsub.f32 %v1505_v26, %v375_v49  ;;  %v978_v57 = vpack.c.bf16 %v375_v49, %v363_v45 }
  0x7d   : > { %v329_v54 = vsub.f32 %v327_v38, %v328_v46  ;;  %614 = vmatmul.mubr.f32.vlgmr.msra.gmra.mrb[0].mxu0 %v328_v46  ;;  %v365_v59 = vand.u32 4294901760, %v364_v52  ;;  %v370_v60 = vsub.f32 %v1519_v35, %v369_v53  ;;  %v381_v61 = vand.u32 4294901760, %v1521_v36  ;;  %p1185_p2 = por %p1184_p6, %p1183_p0 }
  0x7e   : > { %v952_v58 = vpack.c.bf16 %v359_v51, %v347_v50  ;;  %951 = vmatprep.subr.bf16.mxu1 %v950_v55  ;;  %977 = vmatpush1.bf16.msra.mxu0 %v976_v44  ;;  %v377_v63 = vand.u32 4294901760, %v376_v56  ;;  %v958_v6 = vpack.c.bf16 %v1491_v18, %v1489_v17  ;;  %v960_v8 = vpack.c.bf16 %v1497_v23, %v1493_v19 }
  0x7f   : > { %v330_v62 = vand.u32 4294901760, %v329_v54  ;;  %979 = vmatprep.subr.bf16.mxu0 %v978_v57  ;;  %v371_v1 = vand.u32 4294901760, %v370_v60  ;;  %v382_v2 = vsub.f32 %v1521_v36, %v381_v61  ;;  %v980_v3 = vpack.c.bf16 %v381_v61, %v369_v53  ;;  %708 = vmatprep.mubr.f32.mxu0 %v1269_v0  ;;  %p1186_p9 = pnand %p1185_p2, %p1179_p1 }
  0x80   : > { %v954_v4 = vpack.c.bf16 %v377_v63, %v365_v59  ;;  %v962_v9 = vpack.c.bf16 %v1505_v26, %v1501_v25  ;;  %v964_v10 = vpack.c.bf16 %v1521_v36, %v1519_v35 }
  0x81   : > { %331 = vmatmul.mubr.f32.vlgmr.msra.gmra.mrb[0].mxu1 %v330_v62  ;;  %v383_v5 = vand.u32 4294901760, %v382_v2 }
  0x82   : > { %953 = vmatpush1.bf16.msra.mxu1 %v952_v58  ;;  %441 = vmatprep.mubr.f32.mxu1 %v1269_v0 }
  0x83   : > { %955 = vmatprep.subr.bf16.mxu1 %v954_v4  ;;  %981 = vmatpush1.bf16.msra.mxu0 %v980_v3  ;;  %v956_v7 = vpack.c.bf16 %v383_v5, %v371_v1 }
  0x84   : > { %983 = vmatprep.subr.bf16.mxu0 %v1487_v16 }
  0x86   : > { %957 = vmatpush1.bf16.msra.mxu1 %v956_v7  ;;  %710 = vmatmul.mubr.f32.vlgmr.msra.gmra.mrb[0].mxu0 %v1510_v30 }
  0x87   : > { %959 = vmatprep.subr.bf16.mxu1 %v958_v6  ;;  %985 = vmatpush1.bf16.msra.mxu0 %v1495_v22 }
  0x88   : > { %987 = vmatprep.subr.bf16.mxu0 %v1499_v24  ;;  %788 = vmatprep.mubr.f32.mxu0 %v1269_v0 }
  0x89   : > { %443 = vmatmul.mubr.f32.vlgmr.msra.gmra.mrb[0].mxu1 %v1510_v30 }
  0x8a   : > { %961 = vmatpush1.bf16.msra.mxu1 %v960_v8  ;;  %529 = vmatprep.mubr.f32.mxu1 %v1269_v0 }
  0x8b   : > { %963 = vmatprep.subr.bf16.mxu1 %v962_v9  ;;  %989 = vmatpush1.bf16.msra.mxu0 %v1517_v34 }
  0x8e   : > { %965 = vmatpush1.bf16.msra.mxu1 %v964_v10  ;;  %790 = vmatmul.mubr.f32.vlgmr.msra.gmra.mrb[0].mxu0 %v1510_v30 }
  0x91   : > { %532 = vmatmul.mubr.f32.vlgmr.msra.gmra.mrb[0].mxu1 %v327_v38 }
  0xf3   : > { %v247_v12 = vpop.permute.xlu0 %246 }
 0x161   : > { %v791_v11 = vpop.f32.mrb[0].mxu0 }
 0x162   : > { %v793_v13 = vpop.f32.mrb[1].mxu0 }
 0x164   : > { %v533_v14 = vpop.f32.mrb[0].mxu1 }
 0x165   : > { %v990_v15 = vadd.f32 %v533_v14, %v247_v12  ;;  %v535_v16 = vpop.f32.mrb[1].mxu1 }
 0x166   : > { %v992_v17 = vadd.f32 %v535_v16, %v247_v12 }
 0x167   : > { %v991_v18 = vadd.f32 %v990_v15, %v791_v11 }
 0x168   : > { %v993_v0 = vadd.f32 %v992_v17, %v793_v13 }
 0x16a   : > { %v798_v19 = vcombine.low %v991_v18, %v993_v0 }
 0x16c   : > { %800 = vst [vmem:[%s231_s26] sm:$0xff] %v798_v19 }
 0x16d   : > { %1189 = shalt.err (!%p1186_p9)
}
 0x16e   : > { %s1190_s18 = scalar_lea.hbm %s1563_s28, 128  ;;  %s1194_s30 = scalar_lea.hbm %s1615_s3, 256 }
 0x16f   : > { %p1191_p8 = scmp.ne.s32.totalorder %s1563_s28, %s1190_s18  ;;  %p1195_p7 = scmp.lt.u32.totalorder %s1563_s28, %s1615_s3 }
 0x170   : > { %p1196_p12 = scmp.lt.u32.totalorder %s1194_s30, %s1190_s18  ;;  %p1198_p3 = scmp.lt.u32.totalorder %s1190_s18, %s1563_s28 }
 0x171   : > { %p1192_p13 = pnand %p1191_p8, %p1634_p10 }
 0x172   : > { %p1197_p5 = por %p1196_p12, %p1195_p7 }
 0x173   : > { %p1193_p4 = pneg %p1192_p13 }
 0x174   : > { %p1199_p11 = por %p1198_p3, %p1197_p5 }
 0x176   : > { %p1200_p1 = pnand %p1199_p11, %p1193_p4 }
 0x178   : > { %1203 = shalt.err (!%p1200_p1)
}
 0x179   : > { %1012 = dma.vmem_to_hbm [thread:$0]  (%p1634_p10), %s1565_s29, 128, %s1563_s28, %s802_s20  }
 0x17a PF: > { %s830_s21 = sand.u32 1, %s1242_s12   ;;  %p1635_p0 = scmp.ne.s32.totalorder %s1626_s25, 0 }
 0x17b   : > { %p1636_p6 = scmp.ge.s32.totalorder %s1262_s17, 2  ;;  %s831_s23 = scalar_lea.sflag [#allocation4], %s830_s21 }
 0x17d   : > { %p1026_p2 = pnand %p1636_p6, %p1635_p0 }
 0x17f   : > { %1237 = dma.done.wait (!%p1026_p2), %s831_s23, 128  }
 0x180   : > { %1239 = vsyncadd (!%p1026_p2), %s831_s23, 4294967168  ;;  %s20_s17 = sadd.s32 1, %s1262_s17   ;;  %s1637_s12 = smov %s1246_s13 }
 0x181   : > { %p17_p9 = scmp.ge.s32.totalorder %s20_s17, 4   ;;  %s1638_s13 = smov %s1250_s14 }
 0x182   : > { %s1639_s14 = smov %s1440_s11  ;;  %s1640_s15 = smov %s1258_s16 }
 0x183   : > { %s1641_s16 = smov %s1643_s22  ;;  %19 = sbr.rel (!%p17_p9) target bundleno = 7 (0x7), region = 85 }
 0x18a   :  { %836 = vsyncpa [#allocation3], 1 }
 0x18b   :  { %838 = vsyncpa [#allocation3 + $0x1], 1 }
 0x18c   :  { %839 = vsyncpa [#allocation6], 1 }
 0x18d   :  { %840 = vsyncpa [#allocation4], 1 }
 0x18e   :  { %842 = vsyncpa [#allocation4 + $0x1], 1 }

</bundles_post_ra>
